<compile_context>
chip_gen: v5e
topology: v5e:2x2
jax: 0.10.0
libtpu: 0.0.40
codegen_flags: <defaults>
</compile_context>

<pallas_src>
import functools
import math

import jax
import jax.numpy as jnp
import numpy as np
from jax.experimental import pallas as pl
from jax.experimental.pallas import tpu as pltpu

_LANES = 128


def _ce_kernel(logits_ref, labels_ref, loss_ref, stats_ref, *,
               n_classes, ignore_lb, thresh_val, chunk_rows, tile_rows,
               total_rows):
    """Per-pixel cross entropy + per-tile OHEM statistics.

    logits_ref: (1, C, TR, 128)   labels_ref: (1, TR, 128) int32
    loss_ref:   (1, TR, 128) f32  stats_ref:  (1, 1, 8, 128) f32
    """
    tile_row0 = pl.program_id(1) * tile_rows

    def process_chunk(r_start, rows):
        """CE + partial stats for `rows` 128-lane rows starting at r_start."""
        lbl = labels_ref[0, pl.ds(r_start, rows), :]

        # Rows past the true pixel extent (ragged last grid tile) are masked;
        # Pallas drops the corresponding out-of-bounds HBM writeback.
        g_row = (tile_row0 + r_start
                 + jax.lax.broadcasted_iota(jnp.int32, (rows, _LANES), 0))
        in_bounds = g_row < total_rows

        # Pass 1: running max over classes in the logits' native dtype
        # (exact after widening; bf16 inputs stay packed on v6e/v7x).
        m = logits_ref[0, 0, pl.ds(r_start, rows), :]
        for c in range(1, n_classes):
            m = jnp.maximum(m, logits_ref[0, c, pl.ds(r_start, rows), :])
        m = m.astype(jnp.float32)

        # Pass 2: sum-exp + one-hot select of the label logit.
        denom = jnp.zeros((rows, _LANES), jnp.float32)
        gathered = jnp.zeros((rows, _LANES), jnp.float32)
        for c in range(n_classes):
            xc = logits_ref[0, c, pl.ds(r_start, rows), :].astype(jnp.float32)
            denom = denom + jnp.exp(xc - m)
            gathered = jnp.where(lbl == c, xc, gathered)

        lse = jnp.log(denom) + m
        valid = jnp.logical_and(lbl != ignore_lb, in_bounds)
        loss = jnp.where(valid, lse - gathered, 0.0)
        loss_ref[0, pl.ds(r_start, rows), :] = loss

        hard = jnp.logical_and(valid, loss > thresh_val)
        return (jnp.sum(jnp.where(hard, loss, 0.0)),
                jnp.sum(hard.astype(jnp.float32)),
                jnp.sum(valid.astype(jnp.float32)))

    n_full = tile_rows // chunk_rows
    rem = tile_rows - n_full * chunk_rows

    def body(ci, carry):
        s_h, c_h, c_v = carry
        r = pl.multiple_of(ci * chunk_rows, chunk_rows)
        ds_h, dc_h, dc_v = process_chunk(r, chunk_rows)
        return s_h + ds_h, c_h + dc_h, c_v + dc_v

    zero = jnp.float32(0.0)
    s_h, c_h, c_v = jax.lax.fori_loop(0, n_full, body, (zero, zero, zero))

    if rem:  # static tail when tile_rows is not a multiple of chunk_rows
        ds_h, dc_h, dc_v = process_chunk(n_full * chunk_rows, rem)
        s_h, c_h, c_v = s_h + ds_h, c_h + dc_h, c_v + dc_v

    # Pack the three per-tile scalars into lane 0 of rows 0/1/2.
    row = jax.lax.broadcasted_iota(jnp.int32, (8, 128), 0)
    col = jax.lax.broadcasted_iota(jnp.int32, (8, 128), 1)
    lane0 = col == 0
    s = jnp.where(jnp.logical_and(row == 0, lane0), s_h, 0.0)
    s = jnp.where(jnp.logical_and(row == 1, lane0), c_h, s)
    s = jnp.where(jnp.logical_and(row == 2, lane0), c_v, s)
    stats_ref[0, 0] = s


def _round_up(x, m):
    return (x + m - 1) // m * m


def per_pixel_ce(logits, labels, *, ignore_lb=255, thresh_val=0.0,
                 target_tile_pixels=128 * 1024,
                 vmem_budget_bytes=28 * 1024 * 1024,
                 chunk_rows_max=32):
    """Per-pixel CE (reduction='none', ignore_index) on NCHW logits.

    Returns:
      loss : (N, PR, 128) f32 per-pixel CE in pixel-row-major order
             (padded / ignored pixels carry exactly 0 loss).
      stats: (N, GR, 8, 128) f32 per-tile partials; rows 0/1/2 at lane 0 hold
             [sum(loss > thresh), count(loss > thresh), count(valid)].
    """
    N, C, H, W = logits.shape
    labels = labels.astype(jnp.int32)

    P = H * W
    p_pad = _round_up(P, _LANES)

    logits_f = logits.reshape(N, C, P)
    labels_f = labels.reshape(N, P)
    if p_pad != P:
        # TODO(synk): rare lane-pad copy when H*W % 128 != 0; could be removed
        # with an Element-indexed ragged last pixel block.
        logits_f = jnp.pad(logits_f, ((0, 0), (0, 0), (0, p_pad - P)))
        labels_f = jnp.pad(labels_f, ((0, 0), (0, p_pad - P)),
                           constant_values=ignore_lb)
    pr = p_pad // _LANES
    logits_r = logits_f.reshape(N, C, pr, _LANES)   # free reshape
    labels_r = labels_f.reshape(N, pr, _LANES)

    # Tile sizing: ~target_tile_pixels per grid step, capped so the
    # double-buffered VMEM footprint respects the budget (v7x: 64 MiB VMEM).
    logit_bytes = np.dtype(logits.dtype).itemsize
    bytes_per_row = _LANES * (C * logit_bytes + 4 + 4)  # logits + labels + loss
    rows_budget = max(chunk_rows_max, vmem_budget_bytes // (2 * bytes_per_row))
    target_rows = max(chunk_rows_max, target_tile_pixels // _LANES)
    tile_rows = int(min(rows_budget, target_rows))
    tile_rows = max(chunk_rows_max,
                    (tile_rows // chunk_rows_max) * chunk_rows_max)

    if pr <= tile_rows:
        tile_rows = pr                 # single pixel-tile (full-dim block)
        grid_rows = 1
    else:
        grid_rows = -(-pr // tile_rows)  # ragged last tile masked in-kernel

    chunk_rows = min(chunk_rows_max, tile_rows)

    kernel = functools.partial(
        _ce_kernel, n_classes=C, ignore_lb=ignore_lb, thresh_val=thresh_val,
        chunk_rows=chunk_rows, tile_rows=tile_rows, total_rows=pr)

    vmem_limit = int(min(2 * bytes_per_row * tile_rows + (8 << 20), 96 << 20))

    loss, stats = pl.pallas_call(
        kernel,
        out_shape=(
            jax.ShapeDtypeStruct((N, pr, _LANES), jnp.float32),
            jax.ShapeDtypeStruct((N, grid_rows, 8, 128), jnp.float32),
        ),
        grid_spec=pltpu.PrefetchScalarGridSpec(
            num_scalar_prefetch=0,
            grid=(N, grid_rows),
            in_specs=[
                pl.BlockSpec((1, C, tile_rows, _LANES),
                             lambda n, h: (n, 0, h, 0)),
                pl.BlockSpec((1, tile_rows, _LANES), lambda n, h: (n, h, 0)),
            ],
            out_specs=[
                pl.BlockSpec((1, tile_rows, _LANES), lambda n, h: (n, h, 0)),
                pl.BlockSpec((1, 1, 8, 128), lambda n, h: (n, h, 0, 0)),
            ],
        ),
        compiler_params=pltpu.CompilerParams(
            dimension_semantics=("parallel", "parallel"),
            vmem_limit_bytes=vmem_limit),
    )(logits_r, labels_r)

    return loss, stats


def ohem_ce_loss(logits, labels, *, thresh=0.7, ignore_lb=255):
    """Matches OhemCELoss(thresh, ignore_lb).forward(logits, labels)."""
    thresh_val = float(-math.log(thresh))
    loss, stats = per_pixel_ce(logits, labels, ignore_lb=ignore_lb,
                               thresh_val=thresh_val)

    # Reduce per-tile partials (per-tile counts are exact integers in f32).
    sum_hard = jnp.sum(stats[..., 0, 0])
    cnt_hard = jnp.sum(stats[..., 1, 0].astype(jnp.int32))
    n_valid = jnp.sum(stats[..., 2, 0].astype(jnp.int32))
    n_min = n_valid // 16                     # spec: valid pixels // 16

    # Non-valid (ignored / padded) pixels carry exactly 0 loss, matching the
    # PyTorch topk pool; the padded loss is used directly (no slicing copy).
    loss_flat = loss.reshape(-1)

    def _mean_hard(_):
        # 0/0 -> NaN when n_min == 0 and no pixel exceeds the threshold,
        # matching torch.mean of an empty tensor.
        return sum_hard / cnt_hard.astype(jnp.float32)

    def _mean_topk(loss_vec):
        # TODO(synk): for multi-megapixel batches replace the O(P log P)
        # sort+cumsum with a histogram/bisection top-k-sum (O(P) passes).
        sorted_desc = -jnp.sort(-loss_vec)
        csum = jnp.cumsum(sorted_desc)
        k = jnp.maximum(n_min, 1)             # branch only taken when n_min>=1
        return csum[k - 1] / k.astype(jnp.float32)

    return jax.lax.cond(cnt_hard < n_min, _mean_topk, _mean_hard, loss_flat)


if __name__ == "__main__":
    key = jax.random.PRNGKey(0)
    k1, k2 = jax.random.split(key)

    N, C, H, W = 2, 4, 16, 16
    logits = jax.random.normal(k1, (N, C, H, W), dtype=jnp.float32)
    labels = jax.random.randint(k2, (N, H, W), 0, C).astype(jnp.int32)
    labels = labels.at[0, 0, :4].set(255)        # some ignore_index pixels

    fn = jax.jit(functools.partial(ohem_ce_loss, thresh=0.7, ignore_lb=255))
    out = fn(logits, labels)
    jax.block_until_ready(out)

    # numpy (f64) reference of the PyTorch module for a sanity check
    x = np.asarray(logits, dtype=np.float64)
    lbl = np.asarray(labels).reshape(-1)
    xp = np.transpose(x, (0, 2, 3, 1)).reshape(-1, C)
    mm = xp.max(axis=-1, keepdims=True)
    lse = np.log(np.exp(xp - mm).sum(-1)) + mm[:, 0]
    gath = xp[np.arange(xp.shape[0]), np.clip(lbl, 0, C - 1)]
    valid = lbl != 255
    loss_ref = np.where(valid, lse - gath, 0.0)
    th_val = -math.log(0.7)
    n_min = int(valid.sum()) // 16
    hard = loss_ref[loss_ref > th_val]
    if hard.size < n_min:
        hard = np.sort(loss_ref)[::-1][:n_min]
    ref = hard.mean() if hard.size else 0.0

    err = abs(float(out) - float(ref))
    assert err < 5e-4 * max(1.0, abs(float(ref))), (float(out), float(ref))
    print("KERNEL_OK")
</pallas_src>

<mosaic_0001>
module attributes {stable_mosaic.version = 11 : i64} {
  func.func @_ce_kernel(%arg0: i32, %arg1: i32, %arg2: memref<1x4x2x128xf32, #tpu.memory_space<vmem>>, %arg3: memref<1x2x128xi32, #tpu.memory_space<vmem>>, %arg4: memref<1x2x128xf32, #tpu.memory_space<vmem>>, %arg5: memref<1x1x8x128xf32, #tpu.memory_space<vmem>>) attributes {dimension_semantics = [#tpu.dimension_semantics<parallel>, #tpu.dimension_semantics<parallel>], iteration_bounds = array<i64: 2, 1>, scalar_prefetch = 0 : i64, scratch_operands = 0 : i64, tpu.core_type = #tpu.core_type<tc>, window_params = [{transform_indices = @transform_0, window_bounds = array<i64: 1, 4, 2, 128>}, {transform_indices = @transform_1, window_bounds = array<i64: 1, 2, 128>}, {transform_indices = @transform_2, window_bounds = array<i64: 1, 2, 128>}, {transform_indices = @transform_3, window_bounds = array<i64: 1, 1, 8, 128>}]} {
    %c2_i32 = arith.constant 2 : i32
    %0 = arith.muli %arg1, %c2_i32 : i32
    %cst = arith.constant 0.000000e+00 : f32
    %cst_0 = arith.constant 0.000000e+00 : f32
    %cst_1 = arith.constant 0.000000e+00 : f32
    %c0_i32 = arith.constant 0 : i32
    %c2_i32_2 = arith.constant 2 : i32
    %1 = arith.muli %c0_i32, %c2_i32_2 : i32
    %2 = tpu.assume_multiple %1, 2 : i32
    %c0 = arith.constant 0 : index
    %3 = arith.index_cast %2 : i32 to index
    %c0_3 = arith.constant 0 : index
    %4 = vector.load %arg3[%c0, %3, %c0_3] : memref<1x2x128xi32, #tpu.memory_space<vmem>>, vector<1x2x128xi32>
    %5 = vector.shape_cast %4 : vector<1x2x128xi32> to vector<2x128xi32>
    %6 = arith.addi %0, %2 : i32
    %7 = tpu.iota {dimensions = array<i32: 0>} : vector<2x128xi32>
    %8 = vector.broadcast %6 : i32 to vector<2x128xi32>
    %9 = arith.addi %8, %7 : vector<2x128xi32>
    %c2_i32_4 = arith.constant 2 : i32
    %10 = vector.broadcast %c2_i32_4 : i32 to vector<2x128xi32>
    %11 = arith.cmpi slt, %9, %10 : vector<2x128xi32>
    %c0_5 = arith.constant 0 : index
    %c0_6 = arith.constant 0 : index
    %12 = arith.index_cast %2 : i32 to index
    %c0_7 = arith.constant 0 : index
    %13 = vector.load %arg2[%c0_5, %c0_6, %12, %c0_7] : memref<1x4x2x128xf32, #tpu.memory_space<vmem>>, vector<1x1x2x128xf32>
    %14 = vector.shape_cast %13 : vector<1x1x2x128xf32> to vector<2x128xf32>
    %c0_8 = arith.constant 0 : index
    %c1 = arith.constant 1 : index
    %15 = arith.index_cast %2 : i32 to index
    %c0_9 = arith.constant 0 : index
    %16 = vector.load %arg2[%c0_8, %c1, %15, %c0_9] : memref<1x4x2x128xf32, #tpu.memory_space<vmem>>, vector<1x1x2x128xf32>
    %17 = vector.shape_cast %16 : vector<1x1x2x128xf32> to vector<2x128xf32>
    %18 = arith.maximumf %14, %17 : vector<2x128xf32>
    %c0_10 = arith.constant 0 : index
    %c2 = arith.constant 2 : index
    %19 = arith.index_cast %2 : i32 to index
    %c0_11 = arith.constant 0 : index
    %20 = vector.load %arg2[%c0_10, %c2, %19, %c0_11] : memref<1x4x2x128xf32, #tpu.memory_space<vmem>>, vector<1x1x2x128xf32>
    %21 = vector.shape_cast %20 : vector<1x1x2x128xf32> to vector<2x128xf32>
    %22 = arith.maximumf %18, %21 : vector<2x128xf32>
    %c0_12 = arith.constant 0 : index
    %c3 = arith.constant 3 : index
    %23 = arith.index_cast %2 : i32 to index
    %c0_13 = arith.constant 0 : index
    %24 = vector.load %arg2[%c0_12, %c3, %23, %c0_13] : memref<1x4x2x128xf32, #tpu.memory_space<vmem>>, vector<1x1x2x128xf32>
    %25 = vector.shape_cast %24 : vector<1x1x2x128xf32> to vector<2x128xf32>
    %26 = arith.maximumf %22, %25 : vector<2x128xf32>
    %cst_14 = arith.constant 0.000000e+00 : f32
    %27 = vector.broadcast %cst_14 : f32 to vector<2x128xf32>
    %cst_15 = arith.constant 0.000000e+00 : f32
    %28 = vector.broadcast %cst_15 : f32 to vector<2x128xf32>
    %c0_16 = arith.constant 0 : index
    %c0_17 = arith.constant 0 : index
    %29 = arith.index_cast %2 : i32 to index
    %c0_18 = arith.constant 0 : index
    %30 = vector.load %arg2[%c0_16, %c0_17, %29, %c0_18] : memref<1x4x2x128xf32, #tpu.memory_space<vmem>>, vector<1x1x2x128xf32>
    %31 = vector.shape_cast %30 : vector<1x1x2x128xf32> to vector<2x128xf32>
    %32 = arith.subf %31, %26 : vector<2x128xf32>
    %33 = math.exp %32 : vector<2x128xf32>
    %34 = arith.addf %27, %33 : vector<2x128xf32>
    %c0_i32_19 = arith.constant 0 : i32
    %35 = vector.broadcast %c0_i32_19 : i32 to vector<2x128xi32>
    %36 = arith.cmpi eq, %5, %35 : vector<2x128xi32>
    %37 = arith.select %36, %31, %28 : vector<2x128xi1>, vector<2x128xf32>
    %c0_20 = arith.constant 0 : index
    %c1_21 = arith.constant 1 : index
    %38 = arith.index_cast %2 : i32 to index
    %c0_22 = arith.constant 0 : index
    %39 = vector.load %arg2[%c0_20, %c1_21, %38, %c0_22] : memref<1x4x2x128xf32, #tpu.memory_space<vmem>>, vector<1x1x2x128xf32>
    %40 = vector.shape_cast %39 : vector<1x1x2x128xf32> to vector<2x128xf32>
    %41 = arith.subf %40, %26 : vector<2x128xf32>
    %42 = math.exp %41 : vector<2x128xf32>
    %43 = arith.addf %34, %42 : vector<2x128xf32>
    %c1_i32 = arith.constant 1 : i32
    %44 = vector.broadcast %c1_i32 : i32 to vector<2x128xi32>
    %45 = arith.cmpi eq, %5, %44 : vector<2x128xi32>
    %46 = arith.select %45, %40, %37 : vector<2x128xi1>, vector<2x128xf32>
    %c0_23 = arith.constant 0 : index
    %c2_24 = arith.constant 2 : index
    %47 = arith.index_cast %2 : i32 to index
    %c0_25 = arith.constant 0 : index
    %48 = vector.load %arg2[%c0_23, %c2_24, %47, %c0_25] : memref<1x4x2x128xf32, #tpu.memory_space<vmem>>, vector<1x1x2x128xf32>
    %49 = vector.shape_cast %48 : vector<1x1x2x128xf32> to vector<2x128xf32>
    %50 = arith.subf %49, %26 : vector<2x128xf32>
    %51 = math.exp %50 : vector<2x128xf32>
    %52 = arith.addf %43, %51 : vector<2x128xf32>
    %c2_i32_26 = arith.constant 2 : i32
    %53 = vector.broadcast %c2_i32_26 : i32 to vector<2x128xi32>
    %54 = arith.cmpi eq, %5, %53 : vector<2x128xi32>
    %55 = arith.select %54, %49, %46 : vector<2x128xi1>, vector<2x128xf32>
    %c0_27 = arith.constant 0 : index
    %c3_28 = arith.constant 3 : index
    %56 = arith.index_cast %2 : i32 to index
    %c0_29 = arith.constant 0 : index
    %57 = vector.load %arg2[%c0_27, %c3_28, %56, %c0_29] : memref<1x4x2x128xf32, #tpu.memory_space<vmem>>, vector<1x1x2x128xf32>
    %58 = vector.shape_cast %57 : vector<1x1x2x128xf32> to vector<2x128xf32>
    %59 = arith.subf %58, %26 : vector<2x128xf32>
    %60 = math.exp %59 : vector<2x128xf32>
    %61 = arith.addf %52, %60 : vector<2x128xf32>
    %c3_i32 = arith.constant 3 : i32
    %62 = vector.broadcast %c3_i32 : i32 to vector<2x128xi32>
    %63 = arith.cmpi eq, %5, %62 : vector<2x128xi32>
    %64 = arith.select %63, %58, %55 : vector<2x128xi1>, vector<2x128xf32>
    %65 = math.log %61 : vector<2x128xf32>
    %66 = arith.addf %65, %26 : vector<2x128xf32>
    %c255_i32 = arith.constant 255 : i32
    %67 = vector.broadcast %c255_i32 : i32 to vector<2x128xi32>
    %68 = arith.cmpi ne, %5, %67 : vector<2x128xi32>
    %69 = arith.andi %68, %11 : vector<2x128xi1>
    %70 = arith.subf %66, %64 : vector<2x128xf32>
    %cst_30 = arith.constant 0.000000e+00 : f32
    %71 = vector.broadcast %cst_30 : f32 to vector<2x128xf32>
    %72 = arith.select %69, %70, %71 : vector<2x128xi1>, vector<2x128xf32>
    %c0_31 = arith.constant 0 : index
    %73 = arith.index_cast %2 : i32 to index
    %c0_32 = arith.constant 0 : index
    %74 = vector.load %arg4[%c0_31, %73, %c0_32] : memref<1x2x128xf32, #tpu.memory_space<vmem>>, vector<1x2x128xf32>
    %75 = vector.shape_cast %74 : vector<1x2x128xf32> to vector<2x128xf32>
    %76 = vector.shape_cast %72 : vector<2x128xf32> to vector<1x2x128xf32>
    tpu.vector_store %arg4[%c0_31, %73, %c0_32], %76 {strides = array<i32>} : memref<1x2x128xf32, #tpu.memory_space<vmem>>, vector<1x2x128xf32>,
    %cst_33 = arith.constant 0.356674939 : f32
    %77 = vector.broadcast %cst_33 : f32 to vector<2x128xf32>
    %78 = arith.cmpf ogt, %72, %77 : vector<2x128xf32>
    %79 = arith.andi %69, %78 : vector<2x128xi1>
    %cst_34 = arith.constant 0.000000e+00 : f32
    %80 = vector.broadcast %cst_34 : f32 to vector<2x128xf32>
    %81 = arith.select %79, %72, %80 : vector<2x128xi1>, vector<2x128xf32>
    %82 = vector.shape_cast %81 : vector<2x128xf32> to vector<1x2x128xf32>
    %cst_35 = arith.constant dense<0.000000e+00> : vector<1xf32>
    %83 = vector.multi_reduction <add>, %82, %cst_35 [1, 2] : vector<1x2x128xf32> to vector<1xf32>
    %84 = vector.shape_cast %83 : vector<1xf32> to vector<1x1x1xf32>
    %85 = vector.extract %84[0, 0, 0] : f32 from vector<1x1x1xf32>
    %86 = arith.extui %79 : vector<2x128xi1> to vector<2x128xi32>
    %87 = arith.sitofp %86 : vector<2x128xi32> to vector<2x128xf32>
    %88 = vector.shape_cast %87 : vector<2x128xf32> to vector<1x2x128xf32>
    %cst_36 = arith.constant dense<0.000000e+00> : vector<1xf32>
    %89 = vector.multi_reduction <add>, %88, %cst_36 [1, 2] : vector<1x2x128xf32> to vector<1xf32>
    %90 = vector.shape_cast %89 : vector<1xf32> to vector<1x1x1xf32>
    %91 = vector.extract %90[0, 0, 0] : f32 from vector<1x1x1xf32>
    %92 = arith.extui %69 : vector<2x128xi1> to vector<2x128xi32>
    %93 = arith.sitofp %92 : vector<2x128xi32> to vector<2x128xf32>
    %94 = vector.shape_cast %93 : vector<2x128xf32> to vector<1x2x128xf32>
    %cst_37 = arith.constant dense<0.000000e+00> : vector<1xf32>
    %95 = vector.multi_reduction <add>, %94, %cst_37 [1, 2] : vector<1x2x128xf32> to vector<1xf32>
    %96 = vector.shape_cast %95 : vector<1xf32> to vector<1x1x1xf32>
    %97 = vector.extract %96[0, 0, 0] : f32 from vector<1x1x1xf32>
    %98 = arith.addf %cst, %85 : f32
    %99 = arith.addf %cst_0, %91 : f32
    %100 = arith.addf %cst_1, %97 : f32
    %c1_i32_38 = arith.constant 1 : i32
    %101 = tpu.iota {dimensions = array<i32: 0>} : vector<8x128xi32>
    %102 = tpu.iota {dimensions = array<i32: 1>} : vector<8x128xi32>
    %c0_i32_39 = arith.constant 0 : i32
    %103 = vector.broadcast %c0_i32_39 : i32 to vector<8x128xi32>
    %104 = arith.cmpi eq, %102, %103 : vector<8x128xi32>
    %c0_i32_40 = arith.constant 0 : i32
    %105 = vector.broadcast %c0_i32_40 : i32 to vector<8x128xi32>
    %106 = arith.cmpi eq, %101, %105 : vector<8x128xi32>
    %107 = arith.andi %106, %104 : vector<8x128xi1>
    %cst_41 = arith.constant 0.000000e+00 : f32
    %108 = vector.broadcast %98 : f32 to vector<8x128xf32>
    %109 = vector.broadcast %cst_41 : f32 to vector<8x128xf32>
    %110 = arith.select %107, %108, %109 : vector<8x128xi1>, vector<8x128xf32>
    %c1_i32_42 = arith.constant 1 : i32
    %111 = vector.broadcast %c1_i32_42 : i32 to vector<8x128xi32>
    %112 = arith.cmpi eq, %101, %111 : vector<8x128xi32>
    %113 = arith.andi %112, %104 : vector<8x128xi1>
    %114 = vector.broadcast %99 : f32 to vector<8x128xf32>
    %115 = arith.select %113, %114, %110 : vector<8x128xi1>, vector<8x128xf32>
    %c2_i32_43 = arith.constant 2 : i32
    %116 = vector.broadcast %c2_i32_43 : i32 to vector<8x128xi32>
    %117 = arith.cmpi eq, %101, %116 : vector<8x128xi32>
    %118 = arith.andi %117, %104 : vector<8x128xi1>
    %119 = vector.broadcast %100 : f32 to vector<8x128xf32>
    %120 = arith.select %118, %119, %115 : vector<8x128xi1>, vector<8x128xf32>
    %c0_44 = arith.constant 0 : index
    %c0_45 = arith.constant 0 : index
    %c0_46 = arith.constant 0 : index
    %c0_47 = arith.constant 0 : index
    %121 = vector.load %arg5[%c0_44, %c0_45, %c0_46, %c0_47] : memref<1x1x8x128xf32, #tpu.memory_space<vmem>>, vector<1x1x8x128xf32>
    %122 = vector.shape_cast %121 : vector<1x1x8x128xf32> to vector<8x128xf32>
    %123 = vector.shape_cast %120 : vector<8x128xf32> to vector<1x1x8x128xf32>
    tpu.vector_store %arg5[%c0_44, %c0_45, %c0_46, %c0_47], %123 {strides = array<i32>} : memref<1x1x8x128xf32, #tpu.memory_space<vmem>>, vector<1x1x8x128xf32>,
    return
  }
  func.func @transform_0(%arg0: i32, %arg1: i32) -> (i32, i32, i32, i32) {
    %c0_i32 = arith.constant 0 : i32
    %c0_i32_0 = arith.constant 0 : i32
    %c0_i32_1 = arith.constant 0 : i32
    return %arg0, %c0_i32, %arg1, %c0_i32_0 : i32, i32, i32, i32
  }
  func.func @transform_1(%arg0: i32, %arg1: i32) -> (i32, i32, i32) {
    %c0_i32 = arith.constant 0 : i32
    %c0_i32_0 = arith.constant 0 : i32
    return %arg0, %arg1, %c0_i32 : i32, i32, i32
  }
  func.func @transform_2(%arg0: i32, %arg1: i32) -> (i32, i32, i32) {
    %c0_i32 = arith.constant 0 : i32
    %c0_i32_0 = arith.constant 0 : i32
    return %arg0, %arg1, %c0_i32 : i32, i32, i32
  }
  func.func @transform_3(%arg0: i32, %arg1: i32) -> (i32, i32, i32, i32) {
    %c0_i32 = arith.constant 0 : i32
    %c0_i32_0 = arith.constant 0 : i32
    %c0_i32_1 = arith.constant 0 : i32
    return %arg0, %arg1, %c0_i32, %c0_i32_0 : i32, i32, i32, i32
  }
}

</mosaic_0001>

<bundles_post_ra>
// kernel: neg.0
= control target key start
LH: loop header
LB: loop body
LE: loop exit
PB: predicated region body
PF: predicated region fallthrough
CT: control target
= control target key end

     0   :  { %s40_s0 = inlined_call_operand.vmem [shape: f32[2,2,128], index: 0, kind: input, shape index: {}]   ;;  %s41_s1 = inlined_call_operand.vmem [shape: f32[2,2,128], index: 1, kind: output, shape index: {}]  }
   0x1   :  { %v2_v0 = vld [vmem:[%s40_s0] sm:$0x3]  ;;  %v16_v1 = vld [vmem:[%s40_s0 + $0x2] sm:$0x3] }
   0x2   :  { %v5_v2 = vxor.u32 2147483648, %v2_v0  ;;  %v12_v3 = vxor.u32 2147483648, %v16_v1 }
   0x4   :  { %7 = vst [vmem:[%s41_s1] sm:$0x3] %v5_v2 }
   0x5   :  { %17 = vst [vmem:[%s41_s1 + $0x2] sm:$0x3] %v12_v3 }

// kernel: ohem_ce_loss.1
= control target key start
LH: loop header
LB: loop body
LE: loop exit
PB: predicated region body
PF: predicated region fallthrough
CT: control target
= control target key end

     0   :  { %s597_s12 = smov 0   ;;  %s599_s13 = smov 0   ;;  %s669_s0 = inlined_call_operand.vmem [shape: f32[2,4,2,128], index: 0, kind: input, shape index: {}]   ;;  %s670_s1 = inlined_call_operand.vmem [shape: s32[2,2,128], index: 1, kind: input, shape index: {}]   ;;  %s671_s2 = inlined_call_operand.vmem [shape: f32[2,2,128], index: 2, kind: output, shape index: {0}]   ;;  %s672_s3 = inlined_call_operand.vmem [shape: f32[2,1,8,128], index: 3, kind: output, shape index: {1}]  }
   0x1   :  { %s601_s14 = smov 0  }
   0x2 LB: > { %s26_s15 = sadd.s32 1, %s570_s13  ;;  %p497_p0 = scmp.ge.s32.totalorder %s574_s14, 1  ;;  %s574_s14 = sphi %s601_s14, %s14_s14   ;;  %s570_s13 = sphi %s599_s13, %s676_s13   ;;  %s566_s12 = sphi %s597_s12, %s675_s12  }
   0x3   : > { %p28_p1 = scmp.ge.s32.totalorder %s26_s15, 2  ;;  %p175_p2 = scmp.lt.s32.totalorder %s574_s14, 3 }
   0x5   : > { %s678_s15 = smov (%p28_p1, %s26_s15), 0  ;;  %p176_p3 = pnand %p497_p0, %p175_p2 }
   0x6   : > { %p218_p4 = scmp.lt.s32.totalorder (!%p176_p3), %s566_s12, 1 }
   0x7   : > { %179 = sbr.rel (%p176_p3) target bundleno = 248 (0xf8), region = 28 }
   0xc   : > { %s680_s12 = smov (!%p218_p4, %s566_s12), 1  ;;  %v250_v0 = vlaneseq  ;;  %vm303_vm3 = vcmask 1041408   ;;  %v576_v19 = vmov 0.0  }
   0xd   : > { %s510_s16 = sshll.u32 %s680_s12, 3  ;;  %s500_s20 = sshll.u32 %s680_s12, 1 }
   0xe   : > { %s225_s19 = scalar_lea.vmem %s669_s0, %s510_s16  ;;  %s232_s23 = scalar_lea.vmem %s670_s1, %s500_s20  ;;  %v630_v7 = vshrl.u32 %v250_v0, 7  ;;  %v342_v63 = vand.u32 127, %v250_v0 }
   0xf   : > { %v255_v1 = vld [vmem:[%s225_s19] sm:$0x3]  ;;  %v503_v2 = vld [vmem:[%s225_s19 + $0x2] sm:$0x3]  ;;  %v504_v4 = vld [vmem:[%s225_s19 + $0x4] sm:$0x3]  ;;  %s239_s26 = scalar_lea.vmem %s671_s2, %s500_s20  ;;  %s246_s4 = scalar_lea.vmem %s672_s3, %s510_s16 }
  0x10   : > { %v259_v3 = vmax.f32 %v255_v1, %v503_v2  ;;  %v505_v5 = vld [vmem:[%s225_s19 + $0x6] sm:$0x3]  ;;  %v248_v9 = vld [vmem:[%s232_s23] sm:$0x3]  ;;  %vm254_vm0 = vcmp.lt.s32.totalorder %v630_v7, 2  ;;  %vm343_vm10 = vcmp.eq.s32.totalorder %v342_v63, 0 }
  0x11   : > { %vm295_vm1 = vcmp.ne.s32.totalorder %v248_v9, 255  ;;  %vm272_vm4 = vcmp.eq.s32.totalorder %v248_v9, 0  ;;  %vm278_vm5 = vcmp.eq.s32.totalorder %v248_v9, 1  ;;  %vm284_vm6 = vcmp.eq.s32.totalorder %v248_v9, 2 }
  0x12   : > { %v263_v6 = vmax.f32 %v259_v3, %v504_v4  ;;  %vm633_vm2 = vmand %vm295_vm1, %vm254_vm0  ;;  %v273_v29 = vsel %vm272_vm4, %v255_v1, 0.0  ;;  %vm290_vm7 = vcmp.eq.s32.totalorder %v248_v9, 3  ;;  %vm344_vm11 = vcmp.eq.s32.totalorder %v630_v7, 0 }
  0x13   : > { %v507_v20 = vsel %vm633_vm2, 1.0, %v576_v19  ;;  %v279_v30 = vsel %vm278_vm5, %v503_v2, %v273_v29  ;;  %vm348_vm12 = vcmp.eq.s32.totalorder %v630_v7, 1  ;;  %vm352_vm13 = vcmp.eq.s32.totalorder %v630_v7, 2  ;;  %vm345_vm14 = vmand %vm344_vm11, %vm343_vm10 }
  0x14   : > { %v267_v8 = vmax.f32 %v263_v6, %v505_v5  ;;  %v328_v21 = vsel %vm303_vm3, %v507_v20, 0.0  ;;  %v285_v31 = vsel %vm284_vm6, %v504_v4, %v279_v30  ;;  %vm349_vm15 = vmand %vm348_vm12, %vm343_vm10 }
  0x15   : > { %329 = vadd.xlane.f32.xlu1 %v328_v21  ;;  %v291_v34 = vsel %vm290_vm7, %v505_v5, %v285_v31  ;;  %vm353_vm0 = vmand %vm352_vm13, %vm343_vm10 }
  0x16   : > { %v268_v10 = vsub.f32 %v255_v1, %v267_v8  ;;  %v274_v11 = vsub.f32 %v503_v2, %v267_v8  ;;  %v280_v12 = vsub.f32 %v504_v4, %v267_v8  ;;  %v286_v13 = vsub.f32 %v505_v5, %v267_v8 }
  0x18   : > { %v269_v14 = vmul.f32 1.442695, %v268_v10  ;;  %v275_v15 = vmul.f32 1.442695, %v274_v11  ;;  %v281_v16 = vmul.f32 1.442695, %v280_v12 }
  0x19   : > { %v287_v17 = vmul.f32 1.442695, %v286_v13 }
  0x1a   : > { %542 = vpow2.f32 %v269_v14 }
  0x1b   : > { %544 = vpow2.f32 %v275_v15 }
  0x1c   : > { %546 = vpow2.f32 %v281_v16 }
  0x1d   : > { %548 = vpow2.f32 %v287_v17 }
  0x20   : > { %v543_v22 = vpop.eup %542 }
  0x21   : > { %v545_v23 = vpop.eup %544 }
  0x22   : > { %v547_v24 = vpop.eup %546  ;;  %v277_v25 = vadd.f32 %v545_v23, %v543_v22 }
  0x23   : > { %v549_v26 = vpop.eup %548 }
  0x24   : > { %v283_v27 = vadd.f32 %v547_v24, %v277_v25 }
  0x26   : > { %v289_v28 = vadd.f32 %v549_v26, %v283_v27 }
  0x28   : > { %550 = vlog2.f32 %v289_v28 }
  0x2e   : > { %v551_v32 = vpop.eup %550 }
  0x2f   : > { %v293_v33 = vmul.f32 0.6931472, %v551_v32 }
  0x31   : > { %v294_v35 = vadd.f32 %v293_v33, %v267_v8 }
  0x33   : > { %v297_v36 = vsub.f32 %v294_v35, %v291_v34 }
  0x35   : > { %v298_v37 = vsel %vm633_vm2, %v297_v36, 0.0 }
  0x36   : > { %vm300_vm8 = vcmp.gt.f32.partialorder %v298_v37, 0.35667494  ;;  %299 = vst [vmem:[%s239_s26] sm:$0x3] %v298_v37 }
  0x37   : > { %vm301_vm9 = vmand %vm633_vm2, %vm300_vm8 }
  0x38   : > { %v302_v38 = vsel %vm301_vm9, %v298_v37, 0.0  ;;  %v506_v40 = vsel %vm301_vm9, 1.0, %v576_v19 }
  0x39   : > { %v304_v39 = vsel %vm303_vm3, %v302_v38, 0.0  ;;  %v316_v41 = vsel %vm303_vm3, %v506_v40, 0.0 }
  0x3a   : > { %305 = vadd.xlane.f32.xlu0 %v304_v39 }
  0x42   : > { %317 = vadd.xlane.f32.xlu0 %v316_v41 }
  0x88   : > { %v330_v42 = vpop.xlane.xlu1 %329 }
  0x89   : > { %v331_v44 = vrot.slane %v330_v42, 4 }
  0x8b   : > { %v332_v47 = vadd.f32 %v331_v44, %v330_v42 }
  0x8d   : > { %v333_v50 = vrot.slane %v332_v47, 2 }
  0x8f   : > { %v334_v56 = vadd.f32 %v333_v50, %v332_v47 }
  0x91   : > { %v335_v59 = vrot.slane %v334_v56, 1 }
  0x93   : > { %v336_v62 = vadd.f32 %v335_v59, %v334_v56 }
  0xad   : > { %v306_v43 = vpop.xlane.xlu0 %305 }
  0xae   : > { %v307_v45 = vrot.slane %v306_v43, 4 }
  0xb0   : > { %v308_v46 = vadd.f32 %v307_v45, %v306_v43 }
  0xb2   : > { %v309_v48 = vrot.slane %v308_v46, 2 }
  0xb4   : > { %v310_v49 = vadd.f32 %v309_v48, %v308_v46 }
  0xb5   : > { %v318_v51 = vpop.xlane.xlu0 %317 }
  0xb6   : > { %v319_v52 = vrot.slane %v318_v51, 4  ;;  %v311_v53 = vrot.slane %v310_v49, 1 }
  0xb8   : > { %v320_v54 = vadd.f32 %v319_v52, %v318_v51  ;;  %v312_v55 = vadd.f32 %v311_v53, %v310_v49 }
  0xba   : > { %v321_v57 = vrot.slane %v320_v54, 2  ;;  %511 = vpush %v312_v55 }
  0xbc   : > { %v322_v58 = vadd.f32 %v321_v57, %v320_v54 }
  0xbe   : > { %v323_v60 = vrot.slane %v322_v58, 1 }
  0xc0   : > { %v324_v61 = vadd.f32 %v323_v60, %v322_v58 }
  0xc2   : > { %513 = vpush %v324_v61 }
  0xc3   : > { %515 = vpush %v336_v62 }
  0xeb   : > { %s512_s27 = spop %511 }
  0xec   : > { %v346_v1 = vstv %s512_s27 }
  0xed   : > { %v347_v2 = vsel %vm345_vm14, %v346_v1, 0.0 }
  0xf3   : > { %s514_s28 = spop %513 }
  0xf4   : > { %v350_v3 = vstv %s514_s28  ;;  %s516_s5 = spop %515 }
  0xf5   : > { %v351_v0 = vsel %vm349_vm15, %v350_v3, %v347_v2  ;;  %v354_v4 = vstv %s516_s5 }
  0xf6   : > { %v355_v5 = vsel %vm353_vm0, %v354_v4, %v351_v0 }
  0xf7   : > { %356 = vst [vmem:[%s246_s4] sm:$0xff] %v355_v5 }
  0xf8 PF: > { %s14_s14 = sadd.s32 1, %s574_s14   ;;  %s675_s12 = smov %s570_s13 }
  0xf9   : > { %p11_p5 = scmp.ge.s32.totalorder %s14_s14, 4   ;;  %s676_s13 = smov %s678_s15 }
  0xfb   :  { %13 = sbr.rel (!%p11_p5) target bundleno = 2 (0x2), region = 76 }

</bundles_post_ra>
